<compile_context>
chip_gen: v5e
topology: v5e:2x2
jax: 0.10.0
libtpu: 0.0.40
codegen_flags: <defaults>
</compile_context>

<pallas_src>
import functools

import jax
import jax.numpy as jnp
from jax.experimental import pallas as pl
from jax.experimental.pallas import tpu as pltpu

LANE = 128      # every feature dim is padded to a multiple of the 128-wide lane axis
SUBLANE = 8     # batch tiles (when not full-extent) must be a multiple of 8 sublanes


def _round_up(x, m):
    return (x + m - 1) // m * m


def _vmem_capacity_bytes():
    """Per-core VMEM capacity; conservative default if the query fails."""
    try:
        info = pltpu.get_tpu_info()
        cap = getattr(info, "vmem_capacity_bytes", None)
        if cap:
            return int(cap)
    except Exception:
        pass
    return 64 * 2**20   # v7x per-TensorCore VMEM (smallest of the targets)


def _mxu_m_granularity():
    """Preferred M granularity for big batches: 256 on v6e/v7x, 128 on v5-class."""
    try:
        kind = jax.devices()[0].device_kind.lower()
        if any(tag in kind for tag in ("v2", "v3", "v4", "v5")):
            return 128
    except Exception:
        pass
    return 256


def _choose_tile_b(B, bytes_per_row, resident_bytes, vmem_budget, mxu_gran):
    """Pick the batch tile: VMEM-aware, capped at 512 rows, padding bounded by
    one tile, and >= 2 tiles whenever possible so ("parallel",) can use both
    v7x TensorCores."""
    if B <= SUBLANE:
        return B                                   # single full-extent block, zero row padding
    avail = max(vmem_budget - resident_bytes, vmem_budget // 8)
    cap = min(512, avail // max(bytes_per_row, 1))  # 512 rows already ~85% of HBM roofline
    cap = max(SUBLANE, (cap // SUBLANE) * SUBLANE)
    # Use the MXU's M granularity only when the batch is big enough to afford it.
    gran = mxu_gran if (B >= 2 * mxu_gran and cap >= mxu_gran) else SUBLANE
    n_tiles = max(2, pl.cdiv(B, cap))              # >= 2 tiles for megacore sharding
    tile = _round_up(pl.cdiv(B, n_tiles), gran)
    return max(gran, (min(cap, tile) // gran) * gran)


def _mlp_kernel(n_layers, *refs):
    """Fused MLP: [Linear -> ReLU]* -> Linear -> Softmax over a (TILE_B, F) tile.

    refs = (x_ref, w1, b1, ..., wL, bL, out_ref).  Weights are bf16 and stay
    VMEM-resident across batch tiles (constant index_map); only the activation
    tile streams per grid step.  Matmuls accumulate in f32 on the MXU.  The
    softmax needs no explicit padding mask: the last layer's padded bias lanes
    were pre-filled with -1e30 (and its padded weight columns are zero), so the
    padded logits underflow to exactly 0 after exp().
    """
    x_ref = refs[0]
    out_ref = refs[-1]
    params = refs[1:-1]

    h = x_ref[...]
    if h.dtype != jnp.bfloat16:
        h = h.astype(jnp.bfloat16)                 # in-kernel cast (no wrapper round-trip)

    for i in range(n_layers):
        w = params[2 * i][...]                     # bf16 (in_pad, out_pad)
        b = params[2 * i + 1][...]                 # f32  (1, out_pad)
        acc = jnp.dot(h, w, preferred_element_type=jnp.float32) + b
        if i != n_layers - 1:
            # nn.ReLU(); back to bf16 for the next MXU pass.
            h = jnp.maximum(acc, 0.0).astype(jnp.bfloat16)
        else:
            # nn.Softmax(dim=1); padded lanes already carry -1e30 via the bias.
            m = jnp.max(acc, axis=1, keepdims=True)
            e = jnp.exp(acc - m)
            h = e * pl.reciprocal(jnp.sum(e, axis=1, keepdims=True), approx=True)

    out_ref[...] = h.astype(out_ref.dtype)         # bf16, lane-dense 128-wide store


def prepare_params(params, in_features):
    """One-time (init-time) pad + cast of the nn.Linear params for the kernel.

    * every feature dim padded to a multiple of 128 lanes
    * weights -> bf16 (MXU input dtype), biases -> f32
    * the FINAL layer's padded bias lanes are set to -1e30 so the in-kernel
      softmax needs no iota/where mask; hidden-layer padded biases stay 0.
    Returns (flat_params, dims, out_dim).
    """
    n_layers = len(params)
    out_dim = params[-1][0].shape[1]
    dims = [_round_up(in_features, LANE)] + [_round_up(w.shape[1], LANE) for (w, _) in params]

    flat = []
    for li, (w, b) in enumerate(params):
        in_p, out_p = dims[li], dims[li + 1]
        wp = jnp.zeros((in_p, out_p), jnp.bfloat16)
        wp = wp.at[: w.shape[0], : w.shape[1]].set(w.astype(jnp.bfloat16))
        fill = -1e30 if li == n_layers - 1 else 0.0   # softmax mask baked into last bias
        bp = jnp.full((1, out_p), fill, jnp.float32)
        bp = bp.at[:, : b.shape[-1]].set(b.reshape(1, -1).astype(jnp.float32))
        flat.extend([wp, bp])
    return tuple(flat), tuple(dims), out_dim


def classifier_net_forward(x, prepared, tile_b=None):
    """x: [B, C, H, W] (NCHW, like PyTorch).  prepared: output of prepare_params."""
    flat_params, dims, out_dim = prepared
    B = x.shape[0]
    xf = x.reshape(B, -1)                          # nn.Flatten() -- plain-JAX glue
    F = xf.shape[1]
    n_layers = len(flat_params) // 2
    f_pad, out_pad = dims[0], dims[-1]

    vmem_cap = _vmem_capacity_bytes()
    vmem_budget = (vmem_cap * 3) // 4              # leave headroom for compiler temporaries

    # Per-row working-set estimate (double-buffered x + out, f32/bf16 temporaries).
    x_item = 2 if F != f_pad else xf.dtype.itemsize
    bytes_per_row = 2 * f_pad * x_item + 4 * out_pad + 6 * max(dims)
    resident = sum(p.size * p.dtype.itemsize for p in flat_params)   # single-buffered weights

    if tile_b is None:
        tile_b = _choose_tile_b(B, bytes_per_row, resident, vmem_budget, _mxu_m_granularity())
    b_pad = _round_up(B, tile_b)
    num_tiles = b_pad // tile_b

    # Skip the extra HBM round-trip of a wrapper pad/cast whenever possible:
    # pass the flattened f32 input straight to the kernel (cast happens there).
    if F == f_pad and b_pad == B:
        xin = xf
    else:
        xin = jnp.zeros((b_pad, f_pad), jnp.bfloat16)
        xin = xin.at[:B, :F].set(xf.astype(jnp.bfloat16))

    x_spec = pl.BlockSpec((tile_b, f_pad), lambda i: (i, 0))
    out_spec = pl.BlockSpec((tile_b, out_pad), lambda i: (i, 0))

    flops = 2 * b_pad * sum(dims[li] * dims[li + 1] for li in range(n_layers))
    bytes_accessed = (xin.size * xin.dtype.itemsize
                      + resident
                      + b_pad * out_pad * 2)        # bf16 output
    cost = pl.CostEstimate(flops=flops, transcendentals=b_pad * out_pad,
                           bytes_accessed=bytes_accessed)

    kernel = functools.partial(_mlp_kernel, n_layers)

    def _call(single_buffer_params):
        if single_buffer_params:
            # Constant index_map -> weights stay VMEM-resident; 1 buffer halves
            # their VMEM footprint (matters most for the first-layer weight).
            p_specs = [pl.BlockSpec(p.shape, lambda i: (0, 0), pipeline_mode=pl.Buffered(1))
                       for p in flat_params]
        else:
            p_specs = [pl.BlockSpec(p.shape, lambda i: (0, 0)) for p in flat_params]
        return pl.pallas_call(
            kernel,
            out_shape=jax.ShapeDtypeStruct((b_pad, out_pad), jnp.bfloat16),
            grid_spec=pl.GridSpec(
                grid=(num_tiles,),
                in_specs=[x_spec] + p_specs,
                out_specs=out_spec,
            ),
            compiler_params=pltpu.CompilerParams(
                dimension_semantics=("parallel",),
                vmem_limit_bytes=int(vmem_budget),
            ),
            cost_estimate=cost,
        )(xin, *flat_params)

    try:
        out_padded = _call(True)
    except Exception:
        # pipeline_mode / pl.Buffered not supported by this jax version:
        # fall back to default double-buffered params (correctness unchanged).
        out_padded = _call(False)

    # Slice away padding; hand back f32 like the torch module.
    return out_padded[:B, :out_dim].astype(jnp.float32)


def init_params(key, layer_sizes):
    """Deterministic synthetic init matching nn.Linear shapes.

    PyTorch nn.Linear(in, out) has W:(out,in), b:(out,). We store the
    transposed weight (in,out) and the bias as (1,out)."""
    params = []
    for i in range(len(layer_sizes) - 1):
        fan_in, fan_out = layer_sizes[i], layer_sizes[i + 1]
        key, kw, kb = jax.random.split(key, 3)
        bound = 1.0 / jnp.sqrt(fan_in)
        w = jax.random.uniform(kw, (fan_in, fan_out), jnp.float32, -bound, bound)
        b = jax.random.uniform(kb, (1, fan_out), jnp.float32, -bound, bound)
        params.append((w, b))
    return params


def reference_forward(x, params, emulate_bf16=True):
    """Pure-JAX reference of the PyTorch forward (optionally emulating the
    kernel's bf16 weight/activation quantization so tolerances stay tight)."""
    def q(a):
        return a.astype(jnp.bfloat16).astype(jnp.float32) if emulate_bf16 else a

    h = q(x.reshape(x.shape[0], -1))
    n = len(params)
    for i, (w, b) in enumerate(params):
        h = h @ q(w) + b
        if i != n - 1:
            h = q(jnp.maximum(h, 0.0))
        else:
            h = jax.nn.softmax(h, axis=1)
    return h


if __name__ == "__main__":
    key = jax.random.PRNGKey(0)
    kx, kp, kx2 = jax.random.split(key, 3)

    # Small shapes consistent with the module: image-like input flattened to 1024.
    B, C, H, W = 2, 4, 16, 16
    layer_sizes = [C * H * W, 128, 32, 16]

    params = init_params(kp, layer_sizes)
    prepared = prepare_params(params, C * H * W)      # one-time pad/cast (init time)

    # Case 1: B=2 -> single full-extent tile, no batch/feature padding,
    # raw f32 input cast to bf16 inside the kernel.
    x = jax.random.normal(kx, (B, C, H, W), jnp.float32)
    out = jax.block_until_ready(classifier_net_forward(x, prepared))
    ref = reference_forward(x, params)
    assert out.shape == (B, layer_sizes[-1])
    # bf16 matmuls/stores + approx reciprocal -> loosened tolerance vs f32 torch.
    assert jnp.allclose(out, ref, atol=1e-2, rtol=1e-2)
    assert jnp.allclose(jnp.sum(out, axis=1), jnp.ones((B,)), atol=1e-2)

    # Case 2: B=24 -> two batch tiles (megacore-shardable) with a padded last tile.
    B2 = 24
    x2 = jax.random.normal(kx2, (B2, C, H, W), jnp.float32)
    out2 = jax.block_until_ready(classifier_net_forward(x2, prepared))
    ref2 = reference_forward(x2, params)
    assert out2.shape == (B2, layer_sizes[-1])
    assert jnp.allclose(out2, ref2, atol=1e-2, rtol=1e-2)
    assert jnp.allclose(jnp.sum(out2, axis=1), jnp.ones((B2,)), atol=1e-2)

    print("KERNEL_OK")
</pallas_src>

<mosaic_0001>
module attributes {stable_mosaic.version = 11 : i64} {
  func.func @_mlp_kernel(%arg0: i32, %arg1: memref<2x1024xf32, #tpu.memory_space<vmem>>, %arg2: memref<1024x128xbf16, #tpu.memory_space<vmem>>, %arg3: memref<1x128xf32, #tpu.memory_space<vmem>>, %arg4: memref<128x128xbf16, #tpu.memory_space<vmem>>, %arg5: memref<1x128xf32, #tpu.memory_space<vmem>>, %arg6: memref<128x128xbf16, #tpu.memory_space<vmem>>, %arg7: memref<1x128xf32, #tpu.memory_space<vmem>>, %arg8: memref<2x128xbf16, #tpu.memory_space<vmem>>) attributes {dimension_semantics = [#tpu.dimension_semantics<parallel>], iteration_bounds = array<i64: 1>, scalar_prefetch = 0 : i64, scratch_operands = 0 : i64, tpu.core_type = #tpu.core_type<tc>, window_params = [{transform_indices = @transform_0, window_bounds = array<i64: 2, 1024>}, {pipeline_mode = #tpu.pipeline_mode<synchronous>, transform_indices = @transform_1, window_bounds = array<i64: 1024, 128>}, {pipeline_mode = #tpu.pipeline_mode<synchronous>, transform_indices = @transform_2, window_bounds = array<i64: 1, 128>}, {pipeline_mode = #tpu.pipeline_mode<synchronous>, transform_indices = @transform_3, window_bounds = array<i64: 128, 128>}, {pipeline_mode = #tpu.pipeline_mode<synchronous>, transform_indices = @transform_4, window_bounds = array<i64: 1, 128>}, {pipeline_mode = #tpu.pipeline_mode<synchronous>, transform_indices = @transform_5, window_bounds = array<i64: 128, 128>}, {pipeline_mode = #tpu.pipeline_mode<synchronous>, transform_indices = @transform_6, window_bounds = array<i64: 1, 128>}, {transform_indices = @transform_7, window_bounds = array<i64: 2, 128>}]} {
    %c0 = arith.constant 0 : index
    %c0_0 = arith.constant 0 : index
    %0 = vector.load %arg1[%c0, %c0_0] : memref<2x1024xf32, #tpu.memory_space<vmem>>, vector<2x1024xf32>
    %1 = arith.truncf %0 : vector<2x1024xf32> to vector<2x1024xbf16>
    %c0_1 = arith.constant 0 : index
    %c0_2 = arith.constant 0 : index
    %2 = vector.load %arg2[%c0_1, %c0_2] : memref<1024x128xbf16, #tpu.memory_space<vmem>>, vector<1024x128xbf16>
    %c0_3 = arith.constant 0 : index
    %c0_4 = arith.constant 0 : index
    %3 = vector.load %arg3[%c0_3, %c0_4] : memref<1x128xf32, #tpu.memory_space<vmem>>, vector<1x128xf32>
    %cst = arith.constant dense<0.000000e+00> : vector<2x128xf32>
    %4 = tpu.matmul %1, %2, %cst {dimension_numbers = #tpu.dot_dimension_numbers<[1], [0], [0], [1], [0, 0, 1, 1], [], []>} : vector<2x1024xbf16>, vector<1024x128xbf16>, vector<2x128xf32> -> vector<2x128xf32>
    %5 = vector.broadcast %3 : vector<1x128xf32> to vector<2x128xf32>
    %6 = arith.addf %4, %5 : vector<2x128xf32>
    %cst_5 = arith.constant 0.000000e+00 : f32
    %7 = vector.broadcast %cst_5 : f32 to vector<2x128xf32>
    %8 = arith.maximumf %6, %7 : vector<2x128xf32>
    %9 = arith.truncf %8 : vector<2x128xf32> to vector<2x128xbf16>
    %c0_6 = arith.constant 0 : index
    %c0_7 = arith.constant 0 : index
    %10 = vector.load %arg4[%c0_6, %c0_7] : memref<128x128xbf16, #tpu.memory_space<vmem>>, vector<128x128xbf16>
    %c0_8 = arith.constant 0 : index
    %c0_9 = arith.constant 0 : index
    %11 = vector.load %arg5[%c0_8, %c0_9] : memref<1x128xf32, #tpu.memory_space<vmem>>, vector<1x128xf32>
    %cst_10 = arith.constant dense<0.000000e+00> : vector<2x128xf32>
    %12 = tpu.matmul %9, %10, %cst_10 {dimension_numbers = #tpu.dot_dimension_numbers<[1], [0], [0], [1], [0, 0, 1, 1], [], []>} : vector<2x128xbf16>, vector<128x128xbf16>, vector<2x128xf32> -> vector<2x128xf32>
    %13 = vector.broadcast %11 : vector<1x128xf32> to vector<2x128xf32>
    %14 = arith.addf %12, %13 : vector<2x128xf32>
    %cst_11 = arith.constant 0.000000e+00 : f32
    %15 = vector.broadcast %cst_11 : f32 to vector<2x128xf32>
    %16 = arith.maximumf %14, %15 : vector<2x128xf32>
    %17 = arith.truncf %16 : vector<2x128xf32> to vector<2x128xbf16>
    %c0_12 = arith.constant 0 : index
    %c0_13 = arith.constant 0 : index
    %18 = vector.load %arg6[%c0_12, %c0_13] : memref<128x128xbf16, #tpu.memory_space<vmem>>, vector<128x128xbf16>
    %c0_14 = arith.constant 0 : index
    %c0_15 = arith.constant 0 : index
    %19 = vector.load %arg7[%c0_14, %c0_15] : memref<1x128xf32, #tpu.memory_space<vmem>>, vector<1x128xf32>
    %cst_16 = arith.constant dense<0.000000e+00> : vector<2x128xf32>
    %20 = tpu.matmul %17, %18, %cst_16 {dimension_numbers = #tpu.dot_dimension_numbers<[1], [0], [0], [1], [0, 0, 1, 1], [], []>} : vector<2x128xbf16>, vector<128x128xbf16>, vector<2x128xf32> -> vector<2x128xf32>
    %21 = vector.broadcast %19 : vector<1x128xf32> to vector<2x128xf32>
    %22 = arith.addf %20, %21 : vector<2x128xf32>
    %cst_17 = arith.constant dense<0xFF800000> : vector<2xf32>
    %23 = vector.multi_reduction <maximumf>, %22, %cst_17 [1] : vector<2x128xf32> to vector<2xf32>
    %24 = vector.shape_cast %23 : vector<2xf32> to vector<2x1xf32>
    %25 = vector.broadcast %24 : vector<2x1xf32> to vector<2x128xf32>
    %26 = arith.subf %22, %25 : vector<2x128xf32>
    %27 = math.exp %26 : vector<2x128xf32>
    %cst_18 = arith.constant dense<0.000000e+00> : vector<2xf32>
    %28 = vector.multi_reduction <add>, %27, %cst_18 [1] : vector<2x128xf32> to vector<2xf32>
    %29 = vector.shape_cast %28 : vector<2xf32> to vector<2x1xf32>
    %30 = tpu.reciprocal %29 {approx = true} : vector<2x1xf32> -> vector<2x1xf32>
    %31 = vector.broadcast %30 : vector<2x1xf32> to vector<2x128xf32>
    %32 = arith.mulf %27, %31 : vector<2x128xf32>
    %33 = arith.truncf %32 : vector<2x128xf32> to vector<2x128xbf16>
    %c0_19 = arith.constant 0 : index
    %c0_20 = arith.constant 0 : index
    %34 = vector.load %arg8[%c0_19, %c0_20] : memref<2x128xbf16, #tpu.memory_space<vmem>>, vector<2x128xbf16>
    tpu.vector_store %arg8[%c0_19, %c0_20], %33 {strides = array<i32>} : memref<2x128xbf16, #tpu.memory_space<vmem>>, vector<2x128xbf16>,
    return
  }
  func.func @transform_0(%arg0: i32) -> (i32, i32) {
    %c0_i32 = arith.constant 0 : i32
    %c0_i32_0 = arith.constant 0 : i32
    return %arg0, %c0_i32 : i32, i32
  }
  func.func @transform_1(%arg0: i32) -> (i32, i32) {
    %c0_i32 = arith.constant 0 : i32
    %c0_i32_0 = arith.constant 0 : i32
    %c0_i32_1 = arith.constant 0 : i32
    return %c0_i32, %c0_i32_0 : i32, i32
  }
  func.func @transform_2(%arg0: i32) -> (i32, i32) {
    %c0_i32 = arith.constant 0 : i32
    %c0_i32_0 = arith.constant 0 : i32
    %c0_i32_1 = arith.constant 0 : i32
    return %c0_i32, %c0_i32_0 : i32, i32
  }
  func.func @transform_3(%arg0: i32) -> (i32, i32) {
    %c0_i32 = arith.constant 0 : i32
    %c0_i32_0 = arith.constant 0 : i32
    %c0_i32_1 = arith.constant 0 : i32
    return %c0_i32, %c0_i32_0 : i32, i32
  }
  func.func @transform_4(%arg0: i32) -> (i32, i32) {
    %c0_i32 = arith.constant 0 : i32
    %c0_i32_0 = arith.constant 0 : i32
    %c0_i32_1 = arith.constant 0 : i32
    return %c0_i32, %c0_i32_0 : i32, i32
  }
  func.func @transform_5(%arg0: i32) -> (i32, i32) {
    %c0_i32 = arith.constant 0 : i32
    %c0_i32_0 = arith.constant 0 : i32
    %c0_i32_1 = arith.constant 0 : i32
    return %c0_i32, %c0_i32_0 : i32, i32
  }
  func.func @transform_6(%arg0: i32) -> (i32, i32) {
    %c0_i32 = arith.constant 0 : i32
    %c0_i32_0 = arith.constant 0 : i32
    %c0_i32_1 = arith.constant 0 : i32
    return %c0_i32, %c0_i32_0 : i32, i32
  }
  func.func @transform_7(%arg0: i32) -> (i32, i32) {
    %c0_i32 = arith.constant 0 : i32
    %c0_i32_0 = arith.constant 0 : i32
    return %arg0, %c0_i32 : i32, i32
  }
}

module attributes {stable_mosaic.version = 11 : i64} {
  func.func @_mlp_kernel(%arg0: i32, %arg1: memref<2x1024xf32, #tpu.memory_space<vmem>>, %arg2: memref<1024x128xbf16, #tpu.memory_space<vmem>>, %arg3: memref<1x128xf32, #tpu.memory_space<vmem>>, %arg4: memref<128x128xbf16, #tpu.memory_space<vmem>>, %arg5: memref<1x128xf32, #tpu.memory_space<vmem>>, %arg6: memref<128x128xbf16, #tpu.memory_space<vmem>>, %arg7: memref<1x128xf32, #tpu.memory_space<vmem>>, %arg8: memref<2x128xbf16, #tpu.memory_space<vmem>>) attributes {dimension_semantics = [#tpu.dimension_semantics<parallel>], iteration_bounds = array<i64: 1>, scalar_prefetch = 0 : i64, scratch_operands = 0 : i64, tpu.core_type = #tpu.core_type<tc>, window_params = [{transform_indices = @transform_0, window_bounds = array<i64: 2, 1024>}, {pipeline_mode = #tpu.pipeline_mode<synchronous>, transform_indices = @transform_1, window_bounds = array<i64: 1024, 128>}, {pipeline_mode = #tpu.pipeline_mode<synchronous>, transform_indices = @transform_2, window_bounds = array<i64: 1, 128>}, {pipeline_mode = #tpu.pipeline_mode<synchronous>, transform_indices = @transform_3, window_bounds = array<i64: 128, 128>}, {pipeline_mode = #tpu.pipeline_mode<synchronous>, transform_indices = @transform_4, window_bounds = array<i64: 1, 128>}, {pipeline_mode = #tpu.pipeline_mode<synchronous>, transform_indices = @transform_5, window_bounds = array<i64: 128, 128>}, {pipeline_mode = #tpu.pipeline_mode<synchronous>, transform_indices = @transform_6, window_bounds = array<i64: 1, 128>}, {transform_indices = @transform_7, window_bounds = array<i64: 2, 128>}]} {
    %c0 = arith.constant 0 : index
    %c0_0 = arith.constant 0 : index
    %0 = vector.load %arg1[%c0, %c0_0] : memref<2x1024xf32, #tpu.memory_space<vmem>>, vector<2x1024xf32>
    %1 = arith.truncf %0 : vector<2x1024xf32> to vector<2x1024xbf16>
    %c0_1 = arith.constant 0 : index
    %c0_2 = arith.constant 0 : index
    %2 = vector.load %arg2[%c0_1, %c0_2] : memref<1024x128xbf16, #tpu.memory_space<vmem>>, vector<1024x128xbf16>
    %c0_3 = arith.constant 0 : index
    %c0_4 = arith.constant 0 : index
    %3 = vector.load %arg3[%c0_3, %c0_4] : memref<1x128xf32, #tpu.memory_space<vmem>>, vector<1x128xf32>
    %cst = arith.constant dense<0.000000e+00> : vector<2x128xf32>
    %4 = tpu.matmul %1, %2, %cst {dimension_numbers = #tpu.dot_dimension_numbers<[1], [0], [0], [1], [0, 0, 1, 1], [], []>} : vector<2x1024xbf16>, vector<1024x128xbf16>, vector<2x128xf32> -> vector<2x128xf32>
    %5 = vector.broadcast %3 : vector<1x128xf32> to vector<2x128xf32>
    %6 = arith.addf %4, %5 : vector<2x128xf32>
    %cst_5 = arith.constant 0.000000e+00 : f32
    %7 = vector.broadcast %cst_5 : f32 to vector<2x128xf32>
    %8 = arith.maximumf %6, %7 : vector<2x128xf32>
    %9 = arith.truncf %8 : vector<2x128xf32> to vector<2x128xbf16>
    %c0_6 = arith.constant 0 : index
    %c0_7 = arith.constant 0 : index
    %10 = vector.load %arg4[%c0_6, %c0_7] : memref<128x128xbf16, #tpu.memory_space<vmem>>, vector<128x128xbf16>
    %c0_8 = arith.constant 0 : index
    %c0_9 = arith.constant 0 : index
    %11 = vector.load %arg5[%c0_8, %c0_9] : memref<1x128xf32, #tpu.memory_space<vmem>>, vector<1x128xf32>
    %cst_10 = arith.constant dense<0.000000e+00> : vector<2x128xf32>
    %12 = tpu.matmul %9, %10, %cst_10 {dimension_numbers = #tpu.dot_dimension_numbers<[1], [0], [0], [1], [0, 0, 1, 1], [], []>} : vector<2x128xbf16>, vector<128x128xbf16>, vector<2x128xf32> -> vector<2x128xf32>
    %13 = vector.broadcast %11 : vector<1x128xf32> to vector<2x128xf32>
    %14 = arith.addf %12, %13 : vector<2x128xf32>
    %cst_11 = arith.constant 0.000000e+00 : f32
    %15 = vector.broadcast %cst_11 : f32 to vector<2x128xf32>
    %16 = arith.maximumf %14, %15 : vector<2x128xf32>
    %17 = arith.truncf %16 : vector<2x128xf32> to vector<2x128xbf16>
    %c0_12 = arith.constant 0 : index
    %c0_13 = arith.constant 0 : index
    %18 = vector.load %arg6[%c0_12, %c0_13] : memref<128x128xbf16, #tpu.memory_space<vmem>>, vector<128x128xbf16>
    %c0_14 = arith.constant 0 : index
    %c0_15 = arith.constant 0 : index
    %19 = vector.load %arg7[%c0_14, %c0_15] : memref<1x128xf32, #tpu.memory_space<vmem>>, vector<1x128xf32>
    %cst_16 = arith.constant dense<0.000000e+00> : vector<2x128xf32>
    %20 = tpu.matmul %17, %18, %cst_16 {dimension_numbers = #tpu.dot_dimension_numbers<[1], [0], [0], [1], [0, 0, 1, 1], [], []>} : vector<2x128xbf16>, vector<128x128xbf16>, vector<2x128xf32> -> vector<2x128xf32>
    %21 = vector.broadcast %19 : vector<1x128xf32> to vector<2x128xf32>
    %22 = arith.addf %20, %21 : vector<2x128xf32>
    %cst_17 = arith.constant dense<0xFF800000> : vector<2xf32>
    %23 = vector.multi_reduction <maximumf>, %22, %cst_17 [1] : vector<2x128xf32> to vector<2xf32>
    %24 = vector.shape_cast %23 : vector<2xf32> to vector<2x1xf32>
    %25 = vector.broadcast %24 : vector<2x1xf32> to vector<2x128xf32>
    %26 = arith.subf %22, %25 : vector<2x128xf32>
    %27 = math.exp %26 : vector<2x128xf32>
    %cst_18 = arith.constant dense<0.000000e+00> : vector<2xf32>
    %28 = vector.multi_reduction <add>, %27, %cst_18 [1] : vector<2x128xf32> to vector<2xf32>
    %29 = vector.shape_cast %28 : vector<2xf32> to vector<2x1xf32>
    %30 = tpu.reciprocal %29 {approx = true} : vector<2x1xf32> -> vector<2x1xf32>
    %31 = vector.broadcast %30 : vector<2x1xf32> to vector<2x128xf32>
    %32 = arith.mulf %27, %31 : vector<2x128xf32>
    %33 = arith.truncf %32 : vector<2x128xf32> to vector<2x128xbf16>
    %c0_19 = arith.constant 0 : index
    %c0_20 = arith.constant 0 : index
    %34 = vector.load %arg8[%c0_19, %c0_20] : memref<2x128xbf16, #tpu.memory_space<vmem>>, vector<2x128xbf16>
    tpu.vector_store %arg8[%c0_19, %c0_20], %33 {strides = array<i32>} : memref<2x128xbf16, #tpu.memory_space<vmem>>, vector<2x128xbf16>,
    return
  }
  func.func @transform_0(%arg0: i32) -> (i32, i32) {
    %c0_i32 = arith.constant 0 : i32
    %c0_i32_0 = arith.constant 0 : i32
    return %arg0, %c0_i32 : i32, i32
  }
  func.func @transform_1(%arg0: i32) -> (i32, i32) {
    %c0_i32 = arith.constant 0 : i32
    %c0_i32_0 = arith.constant 0 : i32
    %c0_i32_1 = arith.constant 0 : i32
    return %c0_i32, %c0_i32_0 : i32, i32
  }
  func.func @transform_2(%arg0: i32) -> (i32, i32) {
    %c0_i32 = arith.constant 0 : i32
    %c0_i32_0 = arith.constant 0 : i32
    %c0_i32_1 = arith.constant 0 : i32
    return %c0_i32, %c0_i32_0 : i32, i32
  }
  func.func @transform_3(%arg0: i32) -> (i32, i32) {
    %c0_i32 = arith.constant 0 : i32
    %c0_i32_0 = arith.constant 0 : i32
    %c0_i32_1 = arith.constant 0 : i32
    return %c0_i32, %c0_i32_0 : i32, i32
  }
  func.func @transform_4(%arg0: i32) -> (i32, i32) {
    %c0_i32 = arith.constant 0 : i32
    %c0_i32_0 = arith.constant 0 : i32
    %c0_i32_1 = arith.constant 0 : i32
    return %c0_i32, %c0_i32_0 : i32, i32
  }
  func.func @transform_5(%arg0: i32) -> (i32, i32) {
    %c0_i32 = arith.constant 0 : i32
    %c0_i32_0 = arith.constant 0 : i32
    %c0_i32_1 = arith.constant 0 : i32
    return %c0_i32, %c0_i32_0 : i32, i32
  }
  func.func @transform_6(%arg0: i32) -> (i32, i32) {
    %c0_i32 = arith.constant 0 : i32
    %c0_i32_0 = arith.constant 0 : i32
    %c0_i32_1 = arith.constant 0 : i32
    return %c0_i32, %c0_i32_0 : i32, i32
  }
  func.func @transform_7(%arg0: i32) -> (i32, i32) {
    %c0_i32 = arith.constant 0 : i32
    %c0_i32_0 = arith.constant 0 : i32
    return %arg0, %c0_i32 : i32, i32
  }
}

</mosaic_0001>

<bundles_post_ra>
// kernel: tpu_custom_call.1
= control target key start
LH: loop header
LB: loop body
LE: loop exit
PB: predicated region body
PF: predicated region fallthrough
CT: control target
= control target key end

     0   :  { %12 = vsyncpa [#allocation3], 0  ;;  %s1551_s0 = inlined_call_operand.hbm [shape: f32[2,1024], index: 0, kind: input, shape index: {}]   ;;  %s1552_s1 = inlined_call_operand.hbm [shape: bf16[1024,128], index: 1, kind: input, shape index: {}]   ;;  %s1553_s2 = inlined_call_operand.vmem [shape: f32[1,128], index: 2, kind: input, shape index: {}]   ;;  %s1554_s3 = inlined_call_operand.hbm [shape: bf16[128,128], index: 3, kind: input, shape index: {}]   ;;  %s1555_s4 = inlined_call_operand.vmem [shape: f32[1,128], index: 4, kind: input, shape index: {}]   ;;  %s1556_s5 = inlined_call_operand.hbm [shape: bf16[128,128], index: 5, kind: input, shape index: {}]   ;;  %s1557_s6 = inlined_call_operand.vmem [shape: f32[1,128], index: 6, kind: input, shape index: {}]   ;;  %s1558_s7 = inlined_call_operand.hbm [shape: bf16[2,128], index: 7, kind: output, shape index: {}]  }
   0x1   :  { %13 = vsyncpa [#allocation6], 0 }
   0x2   :  { %14 = vsyncpa [#allocation9], 0  ;;  %s31_s26 = sshll.u32 %s1552_s1, 4  ;;  %s32_s26 = int_to_ptr.hbm [resolvable:$true] %s31_s26 }
   0x3   :  { %15 = vsyncpa [#allocation4], 0  ;;  %s1480_s27 = smov [#allocation5]   ;;  %s21_s8 = sshll.u32 %s1551_s0, 4  ;;  %s22_s8 = int_to_ptr.hbm [resolvable:$true] %s21_s8 }
   0x4   :  { %s33_s28 = sshll.u32 %s1480_s27, 4  ;;  %s1481_s9 = smov 64   ;;  %s34_s28 = int_to_ptr.vmem [resolvable:$true] %s33_s28 }
   0x5   :  { %s1482_s10 = smov 4   ;;  %s1483_s11 = smov [#allocation2]  }
   0x6   :  { %39 = dma.hbm_to_vmem [thread:$0]  %s32_s26, 8192, %s34_s28, [#allocation6], %s1481_s9, %s1481_s9, %s1482_s10  }
   0x7   :  { %s23_s12 = sshll.u32 %s1483_s11, 4  ;;  %s46_s15 = sshll.u32 %s1554_s3, 4  ;;  %s24_s12 = int_to_ptr.vmem [resolvable:$true] %s23_s12  ;;  %s47_s15 = int_to_ptr.hbm [resolvable:$true] %s46_s15 }
   0x8   :  { %26 = dma.hbm_to_vmem [thread:$0]  %s22_s8, 256, %s24_s12, [#allocation3]  }
   0x9   :  { %s61_s17 = sshll.u32 %s1556_s5, 4  ;;  %s1484_s18 = smov [#allocation7]   ;;  %s62_s17 = int_to_ptr.hbm [resolvable:$true] %s61_s17 }
   0xa   :  { %s48_s19 = sshll.u32 %s1484_s18, 4  ;;  %s1485_s0 = smov [#allocation8]   ;;  %s49_s19 = int_to_ptr.vmem [resolvable:$true] %s48_s19 }
   0xb   :  { %54 = dma.hbm_to_vmem [thread:$0]  %s47_s15, 1024, %s49_s19, [#allocation6], %s1481_s9, %s1481_s9, %s1482_s10  }
   0xc   :  { %s63_s20 = sshll.u32 %s1485_s0, 4  ;;  %s64_s20 = int_to_ptr.vmem [resolvable:$true] %s63_s20 }
   0xd   :  { %69 = dma.hbm_to_vmem [thread:$0]  %s62_s17, 1024, %s64_s20, [#allocation9], %s1481_s9, %s1481_s9, %s1482_s10  }
   0xe   :  { %1472 = dma.done.wait [#allocation3], 256  }
   0xf   :  { %1473 = vsyncadd [#allocation3], 4294967040 }
  0x10   :  { %1474 = dma.done.wait [#allocation6], 9216  }
  0x11   :  { %1475 = vsyncadd [#allocation6], 4294958080 }
  0x12   :  { %1476 = dma.done.wait [#allocation9], 1024  }
  0x13   :  { %1477 = vsyncadd [#allocation9], 4294966272  ;;  %v1265_v0 = vld [vmem:[#allocation5 + $0x38] sm:$0xff]  ;;  %v1264_v4 = vld [vmem:[#allocation5 + $0x30] sm:$0xff]  ;;  %vm905_vm0 = vcmask 1041408   ;;  %s926_s26 = sshll.u32 %s1558_s7, 4  ;;  %s927_s26 = int_to_ptr.hbm [resolvable:$true] %s926_s26 }
  0x14   :  { %v1273_v1 = vld [vmem:[#allocation5 + $0x78] sm:$0xff]  ;;  %635 = vmatpush.bf16.msra.mxu0 %v1265_v0  ;;  %v1272_v5 = vld [vmem:[#allocation5 + $0x70] sm:$0xff]  ;;  %v1263_v8 = vld [vmem:[#allocation5 + $0x28] sm:$0xff] }
  0x15   :  { %v1281_v2 = vld [vmem:[#allocation5 + $0xb8] sm:$0xff]  ;;  %648 = vmatpush.bf16.msra.mxu1 %v1273_v1  ;;  %v1280_v6 = vld [vmem:[#allocation5 + $0xb0] sm:$0xff]  ;;  %v1271_v9 = vld [vmem:[#allocation5 + $0x68] sm:$0xff] }
  0x16   :  { %v1289_v3 = vld [vmem:[#allocation5 + $0xf8] sm:$0xff]  ;;  %661 = vmatpush.bf16.msra.mxu2 %v1281_v2  ;;  %v1288_v7 = vld [vmem:[#allocation5 + $0xf0] sm:$0xff]  ;;  %v1279_v10 = vld [vmem:[#allocation5 + $0xa8] sm:$0xff] }
  0x17   :  { %674 = vmatpush.bf16.msra.mxu3 %v1289_v3  ;;  %v1287_v11 = vld [vmem:[#allocation5 + $0xe8] sm:$0xff]  ;;  %v1262_v12 = vld [vmem:[#allocation5 + $0x20] sm:$0xff]  ;;  %v88_v16 = vld [vmem:[#allocation2] sm:$0xff] }
  0x18   :  { %636 = vmatpush.bf16.msra.mxu0 %v1264_v4  ;;  %v1270_v13 = vld [vmem:[#allocation5 + $0x60] sm:$0xff]  ;;  %v1261_v17 = vld [vmem:[#allocation5 + $0x18] sm:$0xff]  ;;  %92 = vst [vmem:[#allocation1] ss:$4 sm:$0xff] %v88_v16  ;;  %v1260_v21 = vld [vmem:[#allocation5 + $0x10] sm:$0xff] }
  0x19   :  { %649 = vmatpush.bf16.msra.mxu1 %v1272_v5  ;;  %v1278_v14 = vld [vmem:[#allocation5 + $0xa0] sm:$0xff]  ;;  %v1269_v18 = vld [vmem:[#allocation5 + $0x58] sm:$0xff]  ;;  %v1268_v22 = vld [vmem:[#allocation5 + $0x50] sm:$0xff] }
  0x1a   :  { %662 = vmatpush.bf16.msra.mxu2 %v1280_v6  ;;  %v1286_v15 = vld [vmem:[#allocation5 + $0xe0] sm:$0xff]  ;;  %v1277_v19 = vld [vmem:[#allocation5 + $0x98] sm:$0xff]  ;;  %v1276_v23 = vld [vmem:[#allocation5 + $0x90] sm:$0xff] }
  0x1b   :  { %675 = vmatpush.bf16.msra.mxu3 %v1288_v7  ;;  %v1285_v20 = vld [vmem:[#allocation5 + $0xd8] sm:$0xff]  ;;  %v1284_v24 = vld [vmem:[#allocation5 + $0xd0] sm:$0xff]  ;;  %v1259_v25 = vld [vmem:[#allocation5 + $0x8] sm:$0xff] }
  0x1c   :  { %637 = vmatpush.bf16.msra.mxu0 %v1263_v8  ;;  %v1267_v26 = vld [vmem:[#allocation5 + $0x48] sm:$0xff]  ;;  %v89_v29 = vld [vmem:[#allocation2 + $0x8] sm:$0xff]  ;;  %v1258_v30 = vld [vmem:[#allocation5] sm:$0xff] }
  0x1d   :  { %650 = vmatpush.bf16.msra.mxu1 %v1271_v9  ;;  %v1275_v27 = vld [vmem:[#allocation5 + $0x88] sm:$0xff]  ;;  %v1266_v31 = vld [vmem:[#allocation5 + $0x40] sm:$0xff]  ;;  %94 = vst [vmem:[#allocation1 + $0x20] ss:$4 sm:$0xff] %v89_v29  ;;  %v1297_v34 = vld [vmem:[#allocation5 + $0x138] sm:$0xff] }
  0x1e   :  { %663 = vmatpush.bf16.msra.mxu2 %v1279_v10  ;;  %v1283_v28 = vld [vmem:[#allocation5 + $0xc8] sm:$0xff]  ;;  %v1274_v32 = vld [vmem:[#allocation5 + $0x80] sm:$0xff]  ;;  %v1305_v35 = vld [vmem:[#allocation5 + $0x178] sm:$0xff] }
  0x1f   :  { %676 = vmatpush.bf16.msra.mxu3 %v1287_v11  ;;  %v1282_v33 = vld [vmem:[#allocation5 + $0xc0] sm:$0xff]  ;;  %v97_v36 = vld.sshfl [vmem:[#allocation1 + $0x10] sm:$0xff pattern:$0x73625140]  ;;  %v1296_v46 = vld [vmem:[#allocation5 + $0x130] sm:$0xff] }
  0x20   :  { %638 = vmatpush.bf16.msra.mxu0 %v1262_v12  ;;  %v95_v37 = vld.sshfl [vmem:[#allocation1] sm:$0xff pattern:$0x73625140]  ;;  %v98_v38 = vld.sshfl [vmem:[#allocation1 + $0x18] sm:$0xff pattern:$0x73625140]  ;;  %v113_v42 = vpack.c.bf16 %v97_v36, %v97_v36 }
  0x21   :  { %651 = vmatpush.bf16.msra.mxu1 %v1270_v13  ;;  %v96_v39 = vld.sshfl [vmem:[#allocation1 + $0x8] sm:$0xff pattern:$0x73625140]  ;;  %v1313_v40 = vld [vmem:[#allocation5 + $0x1b8] sm:$0xff]  ;;  %v111_v43 = vpack.c.bf16 %v95_v37, %v95_v37  ;;  %v114_v44 = vpack.c.bf16 %v98_v38, %v98_v38  ;;  %v1295_v50 = vld [vmem:[#allocation5 + $0x128] sm:$0xff] }
  0x22   :  { %664 = vmatpush.bf16.msra.mxu2 %v1278_v14  ;;  %v1321_v41 = vld [vmem:[#allocation5 + $0x1f8] sm:$0xff]  ;;  %v112_v45 = vpack.c.bf16 %v96_v39, %v96_v39  ;;  %v1304_v47 = vld [vmem:[#allocation5 + $0x170] sm:$0xff]  ;;  %v1303_v51 = vld [vmem:[#allocation5 + $0x168] sm:$0xff] }
  0x23   :  { %677 = vmatpush.bf16.msra.mxu3 %v1286_v15  ;;  %v1312_v48 = vld [vmem:[#allocation5 + $0x1b0] sm:$0xff]  ;;  %v1311_v52 = vld [vmem:[#allocation5 + $0x1a8] sm:$0xff]  ;;  %v1294_v54 = vld [vmem:[#allocation5 + $0x120] sm:$0xff] }
  0x24   :  { %639 = vmatpush.bf16.msra.mxu0 %v1261_v17  ;;  %v1320_v49 = vld [vmem:[#allocation5 + $0x1f0] sm:$0xff]  ;;  %v1319_v53 = vld [vmem:[#allocation5 + $0x1e8] sm:$0xff]  ;;  %v1302_v55 = vld [vmem:[#allocation5 + $0x160] sm:$0xff] }
  0x25   :  { %652 = vmatpush.bf16.msra.mxu1 %v1269_v18  ;;  %v1310_v56 = vld [vmem:[#allocation5 + $0x1a0] sm:$0xff]  ;;  %v1293_v58 = vld [vmem:[#allocation5 + $0x118] sm:$0xff]  ;;  %v1292_v62 = vld [vmem:[#allocation5 + $0x110] sm:$0xff] }
  0x26   :  { %665 = vmatpush.bf16.msra.mxu2 %v1277_v19  ;;  %v1318_v57 = vld [vmem:[#allocation5 + $0x1e0] sm:$0xff]  ;;  %v1301_v59 = vld [vmem:[#allocation5 + $0x158] sm:$0xff]  ;;  %v1300_v63 = vld [vmem:[#allocation5 + $0x150] sm:$0xff] }
  0x27   :  { %678 = vmatpush.bf16.msra.mxu3 %v1285_v20  ;;  %v1309_v60 = vld [vmem:[#allocation5 + $0x198] sm:$0xff]  ;;  %v1308_v0 = vld [vmem:[#allocation5 + $0x190] sm:$0xff]  ;;  %v1291_v2 = vld [vmem:[#allocation5 + $0x108] sm:$0xff] }
  0x28   :  { %640 = vmatpush.bf16.msra.mxu0 %v1260_v21  ;;  %v1317_v61 = vld [vmem:[#allocation5 + $0x1d8] sm:$0xff]  ;;  %v1316_v1 = vld [vmem:[#allocation5 + $0x1d0] sm:$0xff]  ;;  %v1299_v3 = vld [vmem:[#allocation5 + $0x148] sm:$0xff] }
  0x29   :  { %653 = vmatpush.bf16.msra.mxu1 %v1268_v22  ;;  %v1307_v4 = vld [vmem:[#allocation5 + $0x188] sm:$0xff]  ;;  %v1290_v6 = vld [vmem:[#allocation5 + $0x100] sm:$0xff]  ;;  %v100_v11 = vld.sshfl [vmem:[#allocation1 + $0x28] sm:$0xff pattern:$0x73625140] }
  0x2a   :  { %666 = vmatpush.bf16.msra.mxu2 %v1276_v23  ;;  %v1315_v5 = vld [vmem:[#allocation5 + $0x1c8] sm:$0xff]  ;;  %v1298_v7 = vld [vmem:[#allocation5 + $0x140] sm:$0xff]  ;;  %v101_v12 = vld.sshfl [vmem:[#allocation1 + $0x30] sm:$0xff pattern:$0x73625140]  ;;  %v116_v15 = vpack.c.bf16 %v100_v11, %v100_v11 }
  0x2b   :  { %679 = vmatpush.bf16.msra.mxu3 %v1284_v24  ;;  %v1306_v8 = vld [vmem:[#allocation5 + $0x180] sm:$0xff]  ;;  %v99_v10 = vld.sshfl [vmem:[#allocation1 + $0x20] sm:$0xff pattern:$0x73625140]  ;;  %v117_v16 = vpack.c.bf16 %v101_v12, %v101_v12  ;;  %v1329_v18 = vld [vmem:[#allocation7 + $0x38] sm:$0xff] }
  0x2c   :  { %641 = vmatpush.bf16.msra.mxu0 %v1259_v25  ;;  %v1314_v9 = vld [vmem:[#allocation5 + $0x1c0] sm:$0xff]  ;;  %v115_v14 = vpack.c.bf16 %v99_v10, %v99_v10  ;;  %v1328_v19 = vld [vmem:[#allocation7 + $0x30] sm:$0xff]  ;;  %v1327_v20 = vld [vmem:[#allocation7 + $0x28] sm:$0xff] }
  0x2d   :  { %654 = vmatpush.bf16.msra.mxu1 %v1267_v26  ;;  %v102_v13 = vld.sshfl [vmem:[#allocation1 + $0x38] sm:$0xff pattern:$0x73625140]  ;;  %v1325_v22 = vld [vmem:[#allocation7 + $0x18] sm:$0xff]  ;;  %v1324_v24 = vld [vmem:[#allocation7 + $0x10] sm:$0xff] }
  0x2e   :  { %667 = vmatpush.bf16.msra.mxu2 %v1275_v27  ;;  %v118_v17 = vpack.c.bf16 %v102_v13, %v102_v13  ;;  %v1326_v21 = vld [vmem:[#allocation7 + $0x20] sm:$0xff]  ;;  %v1323_v26 = vld [vmem:[#allocation7 + $0x8] sm:$0xff]  ;;  %v1336_v36 = vld [vmem:[#allocation8 + $0x30] sm:$0xff] }
  0x2f   :  { %680 = vmatpush.bf16.msra.mxu3 %v1283_v28  ;;  %v1335_v38 = vld [vmem:[#allocation8 + $0x28] sm:$0xff] }
  0x30   :  { %642 = vmatpush.bf16.msra.mxu0 %v1258_v30  ;;  %v1322_v30 = vld [vmem:[#allocation7] sm:$0xff] }
  0x31   :  { %655 = vmatpush.bf16.msra.mxu1 %v1266_v31 }
  0x32   :  { %668 = vmatpush.bf16.msra.mxu2 %v1274_v32  ;;  %v1345_v32 = vld [vmem:[%s1553_s2] ss:$0 sm:$0xff] }
  0x33   :  { %681 = vmatpush.bf16.msra.mxu3 %v1282_v33  ;;  %643 = vmatmul.bf16.vlgmr.msra.gmra.mxu0 %v111_v43  ;;  %v1337_v33 = vld [vmem:[#allocation8 + $0x38] sm:$0xff] }
  0x34   :  { %687 = vmatpush.bf16.msrb.mxu0 %v1297_v34  ;;  %656 = vmatmul.bf16.vlgmr.msra.gmra.mxu1 %v112_v45 }
  0x35   :  { %700 = vmatpush.bf16.msrb.mxu1 %v1305_v35  ;;  %669 = vmatmul.bf16.vlgmr.msra.gmra.mxu2 %v113_v42  ;;  %v1333_v42 = vld [vmem:[#allocation8 + $0x18] sm:$0xff] }
  0x36   :  { %713 = vmatpush.bf16.msrb.mxu2 %v1313_v40  ;;  %682 = vmatmul.bf16.vlgmr.msra.gmra.mxu3 %v114_v44  ;;  %v1334_v40 = vld [vmem:[#allocation8 + $0x20] sm:$0xff] }
  0x37   :  { %726 = vmatpush.bf16.msrb.mxu3 %v1321_v41 }
  0x38   :  { %688 = vmatpush.bf16.msrb.mxu0 %v1296_v46 }
  0x39   :  { %701 = vmatpush.bf16.msrb.mxu1 %v1304_v47  ;;  %v1332_v47 = vld [vmem:[#allocation8 + $0x10] sm:$0xff] }
  0x3a   :  { %714 = vmatpush.bf16.msrb.mxu2 %v1312_v48 }
  0x3b   :  { %727 = vmatpush.bf16.msrb.mxu3 %v1320_v49 }
  0x3c   :  { %689 = vmatpush.bf16.msrb.mxu0 %v1295_v50 }
  0x3d   :  { %702 = vmatpush.bf16.msrb.mxu1 %v1303_v51 }
  0x3e   :  { %715 = vmatpush.bf16.msrb.mxu2 %v1311_v52 }
  0x3f   :  { %728 = vmatpush.bf16.msrb.mxu3 %v1319_v53 }
  0x40   :  { %690 = vmatpush.bf16.msrb.mxu0 %v1294_v54 }
  0x41   :  { %703 = vmatpush.bf16.msrb.mxu1 %v1302_v55 }
  0x42   :  { %716 = vmatpush.bf16.msrb.mxu2 %v1310_v56 }
  0x43   :  { %729 = vmatpush.bf16.msrb.mxu3 %v1318_v57 }
  0x44   :  { %691 = vmatpush.bf16.msrb.mxu0 %v1293_v58 }
  0x45   :  { %704 = vmatpush.bf16.msrb.mxu1 %v1301_v59  ;;  %v1331_v59 = vld [vmem:[#allocation8 + $0x8] sm:$0xff] }
  0x46   :  { %717 = vmatpush.bf16.msrb.mxu2 %v1309_v60  ;;  %v1330_v60 = vld [vmem:[#allocation8] sm:$0xff] }
  0x47   :  { %730 = vmatpush.bf16.msrb.mxu3 %v1317_v61  ;;  %v1346_v61 = vld [vmem:[%s1555_s4] ss:$0 sm:$0xff]  ;;  %s1486_s4 = smov [#allocation10]  }
  0x48   :  { %692 = vmatpush.bf16.msrb.mxu0 %v1292_v62  ;;  %s924_s24 = sshll.u32 %s1486_s4, 4  ;;  %s925_s24 = int_to_ptr.vmem [resolvable:$true] %s924_s24 }
  0x49   :  { %705 = vmatpush.bf16.msrb.mxu1 %v1300_v63 }
  0x4a   :  { %718 = vmatpush.bf16.msrb.mxu2 %v1308_v0 }
  0x4b   :  { %731 = vmatpush.bf16.msrb.mxu3 %v1316_v1 }
  0x4c   :  { %693 = vmatpush.bf16.msrb.mxu0 %v1291_v2 }
  0x4d   :  { %706 = vmatpush.bf16.msrb.mxu1 %v1299_v3  ;;  %v1347_v3 = vld [vmem:[%s1557_s6] ss:$0 sm:$0xff] }
  0x4e   :  { %719 = vmatpush.bf16.msrb.mxu2 %v1307_v4 }
  0x4f   :  { %732 = vmatpush.bf16.msrb.mxu3 %v1315_v5 }
  0x50   :  { %694 = vmatpush.bf16.msrb.mxu0 %v1290_v6 }
  0x51   :  { %707 = vmatpush.bf16.msrb.mxu1 %v1298_v7 }
  0x52   :  { %720 = vmatpush.bf16.msrb.mxu2 %v1306_v8 }
  0x53   :  { %733 = vmatpush.bf16.msrb.mxu3 %v1314_v9  ;;  %695 = vmatmul.bf16.vlgmr.msrb.gmra.mxu0 %v115_v14 }
  0x54   :  { %708 = vmatmul.bf16.vlgmr.msrb.gmra.mxu1 %v116_v15  ;;  %809 = vmatpush.bf16.msra.mxu0 %v1329_v18 }
  0x55   :  { %721 = vmatmul.bf16.vlgmr.msrb.gmra.mxu2 %v117_v16  ;;  %892 = vmatpush.bf16.msra.mxu1 %v1337_v33 }
  0x56   :  { %734 = vmatmul.bf16.vlgmr.msrb.gmra.mxu3 %v118_v17 }
  0x58   :  { %810 = vmatpush.bf16.msra.mxu0 %v1328_v19 }
  0x59   :  { %893 = vmatpush.bf16.msra.mxu1 %v1336_v36 }
  0x5c   :  { %811 = vmatpush.bf16.msra.mxu0 %v1327_v20 }
  0x5d   :  { %894 = vmatpush.bf16.msra.mxu1 %v1335_v38 }
  0x60   :  { %812 = vmatpush.bf16.msra.mxu0 %v1326_v21 }
  0x61   :  { %895 = vmatpush.bf16.msra.mxu1 %v1334_v40 }
  0x64   :  { %813 = vmatpush.bf16.msra.mxu0 %v1325_v22 }
  0x65   :  { %896 = vmatpush.bf16.msra.mxu1 %v1333_v42 }
  0x68   :  { %814 = vmatpush.bf16.msra.mxu0 %v1324_v24 }
  0x69   :  { %897 = vmatpush.bf16.msra.mxu1 %v1332_v47 }
  0x6c   :  { %815 = vmatpush.bf16.msra.mxu0 %v1323_v26 }
  0x6d   :  { %898 = vmatpush.bf16.msra.mxu1 %v1331_v59 }
  0x70   :  { %816 = vmatpush.bf16.msra.mxu0 %v1322_v30 }
  0x71   :  { %899 = vmatpush.bf16.msra.mxu1 %v1330_v60 }
  0xb0   :  { %v644_v23 = vpop.f32.mrf.mxu0 }
  0xb1   :  { %v657_v25 = vpop.f32.mrf.mxu1  ;;  %v645_v37 = vadd.f32 %v1345_v32, %v644_v23 }
  0xb3   :  { %v658_v39 = vadd.f32 %v657_v25, %v645_v37 }
  0xb8   :  { %v670_v27 = vpop.f32.mrf.mxu2  ;;  %v646_v29 = vpop.f32.mrf.mxu0 }
  0xb9   :  { %v683_v28 = vpop.f32.mrf.mxu3  ;;  %v659_v31 = vpop.f32.mrf.mxu1  ;;  %v671_v41 = vadd.f32 %v670_v27, %v658_v39 }
  0xbb   :  { %v684_v43 = vadd.f32 %v683_v28, %v671_v41 }
  0xc0   :  { %v672_v34 = vpop.f32.mrf.mxu2 }
  0xc1   :  { %v685_v35 = vpop.f32.mrf.mxu3 }
  0xd0   :  { %v696_v44 = vpop.f32.mrf.mxu0 }
  0xd1   :  { %v709_v45 = vpop.f32.mrf.mxu1  ;;  %v697_v46 = vadd.f32 %v696_v44, %v684_v43 }
  0xd3   :  { %v710_v48 = vadd.f32 %v709_v45, %v697_v46 }
  0xd8   :  { %v722_v49 = vpop.f32.mrf.mxu2  ;;  %v698_v52 = vpop.f32.mrf.mxu0 }
  0xd9   :  { %v735_v50 = vpop.f32.mrf.mxu3  ;;  %v723_v51 = vadd.f32 %v722_v49, %v710_v48  ;;  %v711_v53 = vpop.f32.mrf.mxu1 }
  0xdb   :  { %v736_v54 = vadd.f32 %v735_v50, %v723_v51 }
  0xdd   :  { %v739_v55 = vmax.f32 %v736_v54, 0.0 }
  0xdf   :  { %v740_v56 = vpack.c.bf16 %v739_v55, %v739_v55 }
  0xe0   :  { %v724_v57 = vpop.f32.mrf.mxu2 }
  0xe1   :  { %v737_v58 = vpop.f32.mrf.mxu3  ;;  %817 = vmatmul.bf16.vlgmr.msra.gmra.mxu0 %v740_v56 }
 0x15e   :  { %v818_v62 = vpop.f32.mrf.mxu0 }
 0x15f   :  { %v819_v63 = vadd.f32 %v1346_v61, %v818_v62 }
 0x161   :  { %v822_v0 = vmax.f32 %v819_v63, 0.0 }
 0x163   :  { %v823_v1 = vpack.c.bf16 %v822_v0, %v822_v0 }
 0x165   :  { %900 = vmatmul.bf16.vlgmr.msra.gmra.mxu1 %v823_v1 }
 0x166   :  { %v820_v2 = vpop.f32.mrf.mxu0 }
 0x1e2   :  { %v901_v4 = vpop.f32.mrf.mxu1 }
 0x1e3   :  { %v902_v5 = vadd.f32 %v1347_v3, %v901_v4 }
 0x1e5   :  { %v906_v6 = vsel %vm905_vm0, %v902_v5, -inf }
 0x1e6   :  { %907 = vmax.xlane.f32.xlu0 %v906_v6 }
 0x1ea   :  { %v903_v7 = vpop.f32.mrf.mxu1 }
 0x259   :  { %v908_v8 = vpop.xlane.xlu0 %907 }
 0x25a   :  { %v909_v9 = vsub.f32 %v902_v5, %v908_v8 }
 0x25c   :  { %v910_v10 = vmul.f32 1.442695, %v909_v9 }
 0x25e   :  { %1348 = vpow2.f32 %v910_v10 }
 0x264   :  { %v1349_v11 = vpop.eup %1348 }
 0x265   :  { %v912_v12 = vsel %vm905_vm0, %v1349_v11, 0.0 }
 0x266   :  { %913 = vadd.xlane.f32.xlu0 %v912_v12 }
 0x2d9   :  { %v914_v13 = vpop.xlane.xlu0 %913 }
 0x2da   :  { %1350 = vrcp.f32 %v914_v13 }
 0x2e0   :  { %v1351_v14 = vpop.eup %1350 }
 0x2e1   :  { %v916_v15 = vmul.f32 %v1351_v14, %v1349_v11 }
 0x2e3   :  { %v917_v16 = vpack.c.bf16 %v916_v15, %v916_v15 }
 0x2e5   :  { %918 = vst [vmem:[#allocation10] sm:$0x1] %v917_v16 }
 0x2e6   :  { %929 = dma.vmem_to_hbm [thread:$0]  %s925_s24, 16, %s927_s26, [#allocation4]  }
 0x2e7   :  { %1478 = dma.done.wait [#allocation4], 16  }
 0x2e8   :  { %1479 = vsyncadd [#allocation4], 4294967280 }
 0x2e9   :  { %934 = vsyncpa [#allocation3], 1 }
 0x2ea   :  { %935 = vsyncpa [#allocation6], 1 }
 0x2eb   :  { %936 = vsyncpa [#allocation9], 1 }
 0x2ec   :  { %937 = vsyncpa [#allocation4], 1 }

// kernel: tpu_custom_call.1
= control target key start
LH: loop header
LB: loop body
LE: loop exit
PB: predicated region body
PF: predicated region fallthrough
CT: control target
= control target key end

     0   :  { %12 = vsyncpa [#allocation3], 0  ;;  %s1551_s0 = inlined_call_operand.hbm [shape: f32[2,1024], index: 0, kind: input, shape index: {}]   ;;  %s1552_s1 = inlined_call_operand.hbm [shape: bf16[1024,128], index: 1, kind: input, shape index: {}]   ;;  %s1553_s2 = inlined_call_operand.vmem [shape: f32[1,128], index: 2, kind: input, shape index: {}]   ;;  %s1554_s3 = inlined_call_operand.hbm [shape: bf16[128,128], index: 3, kind: input, shape index: {}]   ;;  %s1555_s4 = inlined_call_operand.vmem [shape: f32[1,128], index: 4, kind: input, shape index: {}]   ;;  %s1556_s5 = inlined_call_operand.hbm [shape: bf16[128,128], index: 5, kind: input, shape index: {}]   ;;  %s1557_s6 = inlined_call_operand.vmem [shape: f32[1,128], index: 6, kind: input, shape index: {}]   ;;  %s1558_s7 = inlined_call_operand.hbm [shape: bf16[2,128], index: 7, kind: output, shape index: {}]  }
   0x1   :  { %13 = vsyncpa [#allocation6], 0 }
   0x2   :  { %14 = vsyncpa [#allocation9], 0  ;;  %s31_s26 = sshll.u32 %s1552_s1, 4  ;;  %s32_s26 = int_to_ptr.hbm [resolvable:$true] %s31_s26 }
   0x3   :  { %15 = vsyncpa [#allocation4], 0  ;;  %s1480_s27 = smov [#allocation5]   ;;  %s21_s8 = sshll.u32 %s1551_s0, 4  ;;  %s22_s8 = int_to_ptr.hbm [resolvable:$true] %s21_s8 }
   0x4   :  { %s33_s28 = sshll.u32 %s1480_s27, 4  ;;  %s1481_s9 = smov 64   ;;  %s34_s28 = int_to_ptr.vmem [resolvable:$true] %s33_s28 }
   0x5   :  { %s1482_s10 = smov 4   ;;  %s1483_s11 = smov [#allocation2]  }
   0x6   :  { %39 = dma.hbm_to_vmem [thread:$0]  %s32_s26, 8192, %s34_s28, [#allocation6], %s1481_s9, %s1481_s9, %s1482_s10  }
   0x7   :  { %s23_s12 = sshll.u32 %s1483_s11, 4  ;;  %s46_s15 = sshll.u32 %s1554_s3, 4  ;;  %s24_s12 = int_to_ptr.vmem [resolvable:$true] %s23_s12  ;;  %s47_s15 = int_to_ptr.hbm [resolvable:$true] %s46_s15 }
   0x8   :  { %26 = dma.hbm_to_vmem [thread:$0]  %s22_s8, 256, %s24_s12, [#allocation3]  }
   0x9   :  { %s61_s17 = sshll.u32 %s1556_s5, 4  ;;  %s1484_s18 = smov [#allocation7]   ;;  %s62_s17 = int_to_ptr.hbm [resolvable:$true] %s61_s17 }
   0xa   :  { %s48_s19 = sshll.u32 %s1484_s18, 4  ;;  %s1485_s0 = smov [#allocation8]   ;;  %s49_s19 = int_to_ptr.vmem [resolvable:$true] %s48_s19 }
   0xb   :  { %54 = dma.hbm_to_vmem [thread:$0]  %s47_s15, 1024, %s49_s19, [#allocation6], %s1481_s9, %s1481_s9, %s1482_s10  }
   0xc   :  { %s63_s20 = sshll.u32 %s1485_s0, 4  ;;  %s64_s20 = int_to_ptr.vmem [resolvable:$true] %s63_s20 }
   0xd   :  { %69 = dma.hbm_to_vmem [thread:$0]  %s62_s17, 1024, %s64_s20, [#allocation9], %s1481_s9, %s1481_s9, %s1482_s10  }
   0xe   :  { %1472 = dma.done.wait [#allocation3], 256  }
   0xf   :  { %1473 = vsyncadd [#allocation3], 4294967040 }
  0x10   :  { %1474 = dma.done.wait [#allocation6], 9216  }
  0x11   :  { %1475 = vsyncadd [#allocation6], 4294958080 }
  0x12   :  { %1476 = dma.done.wait [#allocation9], 1024  }
  0x13   :  { %1477 = vsyncadd [#allocation9], 4294966272  ;;  %v1265_v0 = vld [vmem:[#allocation5 + $0x38] sm:$0xff]  ;;  %v1264_v4 = vld [vmem:[#allocation5 + $0x30] sm:$0xff]  ;;  %vm905_vm0 = vcmask 1041408   ;;  %s926_s26 = sshll.u32 %s1558_s7, 4  ;;  %s927_s26 = int_to_ptr.hbm [resolvable:$true] %s926_s26 }
  0x14   :  { %v1273_v1 = vld [vmem:[#allocation5 + $0x78] sm:$0xff]  ;;  %635 = vmatpush.bf16.msra.mxu0 %v1265_v0  ;;  %v1272_v5 = vld [vmem:[#allocation5 + $0x70] sm:$0xff]  ;;  %v1263_v8 = vld [vmem:[#allocation5 + $0x28] sm:$0xff] }
  0x15   :  { %v1281_v2 = vld [vmem:[#allocation5 + $0xb8] sm:$0xff]  ;;  %648 = vmatpush.bf16.msra.mxu1 %v1273_v1  ;;  %v1280_v6 = vld [vmem:[#allocation5 + $0xb0] sm:$0xff]  ;;  %v1271_v9 = vld [vmem:[#allocation5 + $0x68] sm:$0xff] }
  0x16   :  { %v1289_v3 = vld [vmem:[#allocation5 + $0xf8] sm:$0xff]  ;;  %661 = vmatpush.bf16.msra.mxu2 %v1281_v2  ;;  %v1288_v7 = vld [vmem:[#allocation5 + $0xf0] sm:$0xff]  ;;  %v1279_v10 = vld [vmem:[#allocation5 + $0xa8] sm:$0xff] }
  0x17   :  { %674 = vmatpush.bf16.msra.mxu3 %v1289_v3  ;;  %v1287_v11 = vld [vmem:[#allocation5 + $0xe8] sm:$0xff]  ;;  %v1262_v12 = vld [vmem:[#allocation5 + $0x20] sm:$0xff]  ;;  %v88_v16 = vld [vmem:[#allocation2] sm:$0xff] }
  0x18   :  { %636 = vmatpush.bf16.msra.mxu0 %v1264_v4  ;;  %v1270_v13 = vld [vmem:[#allocation5 + $0x60] sm:$0xff]  ;;  %v1261_v17 = vld [vmem:[#allocation5 + $0x18] sm:$0xff]  ;;  %92 = vst [vmem:[#allocation1] ss:$4 sm:$0xff] %v88_v16  ;;  %v1260_v21 = vld [vmem:[#allocation5 + $0x10] sm:$0xff] }
  0x19   :  { %649 = vmatpush.bf16.msra.mxu1 %v1272_v5  ;;  %v1278_v14 = vld [vmem:[#allocation5 + $0xa0] sm:$0xff]  ;;  %v1269_v18 = vld [vmem:[#allocation5 + $0x58] sm:$0xff]  ;;  %v1268_v22 = vld [vmem:[#allocation5 + $0x50] sm:$0xff] }
  0x1a   :  { %662 = vmatpush.bf16.msra.mxu2 %v1280_v6  ;;  %v1286_v15 = vld [vmem:[#allocation5 + $0xe0] sm:$0xff]  ;;  %v1277_v19 = vld [vmem:[#allocation5 + $0x98] sm:$0xff]  ;;  %v1276_v23 = vld [vmem:[#allocation5 + $0x90] sm:$0xff] }
  0x1b   :  { %675 = vmatpush.bf16.msra.mxu3 %v1288_v7  ;;  %v1285_v20 = vld [vmem:[#allocation5 + $0xd8] sm:$0xff]  ;;  %v1284_v24 = vld [vmem:[#allocation5 + $0xd0] sm:$0xff]  ;;  %v1259_v25 = vld [vmem:[#allocation5 + $0x8] sm:$0xff] }
  0x1c   :  { %637 = vmatpush.bf16.msra.mxu0 %v1263_v8  ;;  %v1267_v26 = vld [vmem:[#allocation5 + $0x48] sm:$0xff]  ;;  %v89_v29 = vld [vmem:[#allocation2 + $0x8] sm:$0xff]  ;;  %v1258_v30 = vld [vmem:[#allocation5] sm:$0xff] }
  0x1d   :  { %650 = vmatpush.bf16.msra.mxu1 %v1271_v9  ;;  %v1275_v27 = vld [vmem:[#allocation5 + $0x88] sm:$0xff]  ;;  %v1266_v31 = vld [vmem:[#allocation5 + $0x40] sm:$0xff]  ;;  %94 = vst [vmem:[#allocation1 + $0x20] ss:$4 sm:$0xff] %v89_v29  ;;  %v1297_v34 = vld [vmem:[#allocation5 + $0x138] sm:$0xff] }
  0x1e   :  { %663 = vmatpush.bf16.msra.mxu2 %v1279_v10  ;;  %v1283_v28 = vld [vmem:[#allocation5 + $0xc8] sm:$0xff]  ;;  %v1274_v32 = vld [vmem:[#allocation5 + $0x80] sm:$0xff]  ;;  %v1305_v35 = vld [vmem:[#allocation5 + $0x178] sm:$0xff] }
  0x1f   :  { %676 = vmatpush.bf16.msra.mxu3 %v1287_v11  ;;  %v1282_v33 = vld [vmem:[#allocation5 + $0xc0] sm:$0xff]  ;;  %v97_v36 = vld.sshfl [vmem:[#allocation1 + $0x10] sm:$0xff pattern:$0x73625140]  ;;  %v1296_v46 = vld [vmem:[#allocation5 + $0x130] sm:$0xff] }
  0x20   :  { %638 = vmatpush.bf16.msra.mxu0 %v1262_v12  ;;  %v95_v37 = vld.sshfl [vmem:[#allocation1] sm:$0xff pattern:$0x73625140]  ;;  %v98_v38 = vld.sshfl [vmem:[#allocation1 + $0x18] sm:$0xff pattern:$0x73625140]  ;;  %v113_v42 = vpack.c.bf16 %v97_v36, %v97_v36 }
  0x21   :  { %651 = vmatpush.bf16.msra.mxu1 %v1270_v13  ;;  %v96_v39 = vld.sshfl [vmem:[#allocation1 + $0x8] sm:$0xff pattern:$0x73625140]  ;;  %v1313_v40 = vld [vmem:[#allocation5 + $0x1b8] sm:$0xff]  ;;  %v111_v43 = vpack.c.bf16 %v95_v37, %v95_v37  ;;  %v114_v44 = vpack.c.bf16 %v98_v38, %v98_v38  ;;  %v1295_v50 = vld [vmem:[#allocation5 + $0x128] sm:$0xff] }
  0x22   :  { %664 = vmatpush.bf16.msra.mxu2 %v1278_v14  ;;  %v1321_v41 = vld [vmem:[#allocation5 + $0x1f8] sm:$0xff]  ;;  %v112_v45 = vpack.c.bf16 %v96_v39, %v96_v39  ;;  %v1304_v47 = vld [vmem:[#allocation5 + $0x170] sm:$0xff]  ;;  %v1303_v51 = vld [vmem:[#allocation5 + $0x168] sm:$0xff] }
  0x23   :  { %677 = vmatpush.bf16.msra.mxu3 %v1286_v15  ;;  %v1312_v48 = vld [vmem:[#allocation5 + $0x1b0] sm:$0xff]  ;;  %v1311_v52 = vld [vmem:[#allocation5 + $0x1a8] sm:$0xff]  ;;  %v1294_v54 = vld [vmem:[#allocation5 + $0x120] sm:$0xff] }
  0x24   :  { %639 = vmatpush.bf16.msra.mxu0 %v1261_v17  ;;  %v1320_v49 = vld [vmem:[#allocation5 + $0x1f0] sm:$0xff]  ;;  %v1319_v53 = vld [vmem:[#allocation5 + $0x1e8] sm:$0xff]  ;;  %v1302_v55 = vld [vmem:[#allocation5 + $0x160] sm:$0xff] }
  0x25   :  { %652 = vmatpush.bf16.msra.mxu1 %v1269_v18  ;;  %v1310_v56 = vld [vmem:[#allocation5 + $0x1a0] sm:$0xff]  ;;  %v1293_v58 = vld [vmem:[#allocation5 + $0x118] sm:$0xff]  ;;  %v1292_v62 = vld [vmem:[#allocation5 + $0x110] sm:$0xff] }
  0x26   :  { %665 = vmatpush.bf16.msra.mxu2 %v1277_v19  ;;  %v1318_v57 = vld [vmem:[#allocation5 + $0x1e0] sm:$0xff]  ;;  %v1301_v59 = vld [vmem:[#allocation5 + $0x158] sm:$0xff]  ;;  %v1300_v63 = vld [vmem:[#allocation5 + $0x150] sm:$0xff] }
  0x27   :  { %678 = vmatpush.bf16.msra.mxu3 %v1285_v20  ;;  %v1309_v60 = vld [vmem:[#allocation5 + $0x198] sm:$0xff]  ;;  %v1308_v0 = vld [vmem:[#allocation5 + $0x190] sm:$0xff]  ;;  %v1291_v2 = vld [vmem:[#allocation5 + $0x108] sm:$0xff] }
  0x28   :  { %640 = vmatpush.bf16.msra.mxu0 %v1260_v21  ;;  %v1317_v61 = vld [vmem:[#allocation5 + $0x1d8] sm:$0xff]  ;;  %v1316_v1 = vld [vmem:[#allocation5 + $0x1d0] sm:$0xff]  ;;  %v1299_v3 = vld [vmem:[#allocation5 + $0x148] sm:$0xff] }
  0x29   :  { %653 = vmatpush.bf16.msra.mxu1 %v1268_v22  ;;  %v1307_v4 = vld [vmem:[#allocation5 + $0x188] sm:$0xff]  ;;  %v1290_v6 = vld [vmem:[#allocation5 + $0x100] sm:$0xff]  ;;  %v100_v11 = vld.sshfl [vmem:[#allocation1 + $0x28] sm:$0xff pattern:$0x73625140] }
  0x2a   :  { %666 = vmatpush.bf16.msra.mxu2 %v1276_v23  ;;  %v1315_v5 = vld [vmem:[#allocation5 + $0x1c8] sm:$0xff]  ;;  %v1298_v7 = vld [vmem:[#allocation5 + $0x140] sm:$0xff]  ;;  %v101_v12 = vld.sshfl [vmem:[#allocation1 + $0x30] sm:$0xff pattern:$0x73625140]  ;;  %v116_v15 = vpack.c.bf16 %v100_v11, %v100_v11 }
  0x2b   :  { %679 = vmatpush.bf16.msra.mxu3 %v1284_v24  ;;  %v1306_v8 = vld [vmem:[#allocation5 + $0x180] sm:$0xff]  ;;  %v99_v10 = vld.sshfl [vmem:[#allocation1 + $0x20] sm:$0xff pattern:$0x73625140]  ;;  %v117_v16 = vpack.c.bf16 %v101_v12, %v101_v12  ;;  %v1329_v18 = vld [vmem:[#allocation7 + $0x38] sm:$0xff] }
  0x2c   :  { %641 = vmatpush.bf16.msra.mxu0 %v1259_v25  ;;  %v1314_v9 = vld [vmem:[#allocation5 + $0x1c0] sm:$0xff]  ;;  %v115_v14 = vpack.c.bf16 %v99_v10, %v99_v10  ;;  %v1328_v19 = vld [vmem:[#allocation7 + $0x30] sm:$0xff]  ;;  %v1327_v20 = vld [vmem:[#allocation7 + $0x28] sm:$0xff] }
  0x2d   :  { %654 = vmatpush.bf16.msra.mxu1 %v1267_v26  ;;  %v102_v13 = vld.sshfl [vmem:[#allocation1 + $0x38] sm:$0xff pattern:$0x73625140]  ;;  %v1325_v22 = vld [vmem:[#allocation7 + $0x18] sm:$0xff]  ;;  %v1324_v24 = vld [vmem:[#allocation7 + $0x10] sm:$0xff] }
  0x2e   :  { %667 = vmatpush.bf16.msra.mxu2 %v1275_v27  ;;  %v118_v17 = vpack.c.bf16 %v102_v13, %v102_v13  ;;  %v1326_v21 = vld [vmem:[#allocation7 + $0x20] sm:$0xff]  ;;  %v1323_v26 = vld [vmem:[#allocation7 + $0x8] sm:$0xff]  ;;  %v1336_v36 = vld [vmem:[#allocation8 + $0x30] sm:$0xff] }
  0x2f   :  { %680 = vmatpush.bf16.msra.mxu3 %v1283_v28  ;;  %v1335_v38 = vld [vmem:[#allocation8 + $0x28] sm:$0xff] }
  0x30   :  { %642 = vmatpush.bf16.msra.mxu0 %v1258_v30  ;;  %v1322_v30 = vld [vmem:[#allocation7] sm:$0xff] }
  0x31   :  { %655 = vmatpush.bf16.msra.mxu1 %v1266_v31 }
  0x32   :  { %668 = vmatpush.bf16.msra.mxu2 %v1274_v32  ;;  %v1345_v32 = vld [vmem:[%s1553_s2] ss:$0 sm:$0xff] }
  0x33   :  { %681 = vmatpush.bf16.msra.mxu3 %v1282_v33  ;;  %643 = vmatmul.bf16.vlgmr.msra.gmra.mxu0 %v111_v43  ;;  %v1337_v33 = vld [vmem:[#allocation8 + $0x38] sm:$0xff] }
  0x34   :  { %687 = vmatpush.bf16.msrb.mxu0 %v1297_v34  ;;  %656 = vmatmul.bf16.vlgmr.msra.gmra.mxu1 %v112_v45 }
  0x35   :  { %700 = vmatpush.bf16.msrb.mxu1 %v1305_v35  ;;  %669 = vmatmul.bf16.vlgmr.msra.gmra.mxu2 %v113_v42  ;;  %v1333_v42 = vld [vmem:[#allocation8 + $0x18] sm:$0xff] }
  0x36   :  { %713 = vmatpush.bf16.msrb.mxu2 %v1313_v40  ;;  %682 = vmatmul.bf16.vlgmr.msra.gmra.mxu3 %v114_v44  ;;  %v1334_v40 = vld [vmem:[#allocation8 + $0x20] sm:$0xff] }
  0x37   :  { %726 = vmatpush.bf16.msrb.mxu3 %v1321_v41 }
  0x38   :  { %688 = vmatpush.bf16.msrb.mxu0 %v1296_v46 }
  0x39   :  { %701 = vmatpush.bf16.msrb.mxu1 %v1304_v47  ;;  %v1332_v47 = vld [vmem:[#allocation8 + $0x10] sm:$0xff] }
  0x3a   :  { %714 = vmatpush.bf16.msrb.mxu2 %v1312_v48 }
  0x3b   :  { %727 = vmatpush.bf16.msrb.mxu3 %v1320_v49 }
  0x3c   :  { %689 = vmatpush.bf16.msrb.mxu0 %v1295_v50 }
  0x3d   :  { %702 = vmatpush.bf16.msrb.mxu1 %v1303_v51 }
  0x3e   :  { %715 = vmatpush.bf16.msrb.mxu2 %v1311_v52 }
  0x3f   :  { %728 = vmatpush.bf16.msrb.mxu3 %v1319_v53 }
  0x40   :  { %690 = vmatpush.bf16.msrb.mxu0 %v1294_v54 }
  0x41   :  { %703 = vmatpush.bf16.msrb.mxu1 %v1302_v55 }
  0x42   :  { %716 = vmatpush.bf16.msrb.mxu2 %v1310_v56 }
  0x43   :  { %729 = vmatpush.bf16.msrb.mxu3 %v1318_v57 }
  0x44   :  { %691 = vmatpush.bf16.msrb.mxu0 %v1293_v58 }
  0x45   :  { %704 = vmatpush.bf16.msrb.mxu1 %v1301_v59  ;;  %v1331_v59 = vld [vmem:[#allocation8 + $0x8] sm:$0xff] }
  0x46   :  { %717 = vmatpush.bf16.msrb.mxu2 %v1309_v60  ;;  %v1330_v60 = vld [vmem:[#allocation8] sm:$0xff] }
  0x47   :  { %730 = vmatpush.bf16.msrb.mxu3 %v1317_v61  ;;  %v1346_v61 = vld [vmem:[%s1555_s4] ss:$0 sm:$0xff]  ;;  %s1486_s4 = smov [#allocation10]  }
  0x48   :  { %692 = vmatpush.bf16.msrb.mxu0 %v1292_v62  ;;  %s924_s24 = sshll.u32 %s1486_s4, 4  ;;  %s925_s24 = int_to_ptr.vmem [resolvable:$true] %s924_s24 }
  0x49   :  { %705 = vmatpush.bf16.msrb.mxu1 %v1300_v63 }
  0x4a   :  { %718 = vmatpush.bf16.msrb.mxu2 %v1308_v0 }
  0x4b   :  { %731 = vmatpush.bf16.msrb.mxu3 %v1316_v1 }
  0x4c   :  { %693 = vmatpush.bf16.msrb.mxu0 %v1291_v2 }
  0x4d   :  { %706 = vmatpush.bf16.msrb.mxu1 %v1299_v3  ;;  %v1347_v3 = vld [vmem:[%s1557_s6] ss:$0 sm:$0xff] }
  0x4e   :  { %719 = vmatpush.bf16.msrb.mxu2 %v1307_v4 }
  0x4f   :  { %732 = vmatpush.bf16.msrb.mxu3 %v1315_v5 }
  0x50   :  { %694 = vmatpush.bf16.msrb.mxu0 %v1290_v6 }
  0x51   :  { %707 = vmatpush.bf16.msrb.mxu1 %v1298_v7 }
  0x52   :  { %720 = vmatpush.bf16.msrb.mxu2 %v1306_v8 }
  0x53   :  { %733 = vmatpush.bf16.msrb.mxu3 %v1314_v9  ;;  %695 = vmatmul.bf16.vlgmr.msrb.gmra.mxu0 %v115_v14 }
  0x54   :  { %708 = vmatmul.bf16.vlgmr.msrb.gmra.mxu1 %v116_v15  ;;  %809 = vmatpush.bf16.msra.mxu0 %v1329_v18 }
  0x55   :  { %721 = vmatmul.bf16.vlgmr.msrb.gmra.mxu2 %v117_v16  ;;  %892 = vmatpush.bf16.msra.mxu1 %v1337_v33 }
  0x56   :  { %734 = vmatmul.bf16.vlgmr.msrb.gmra.mxu3 %v118_v17 }
  0x58   :  { %810 = vmatpush.bf16.msra.mxu0 %v1328_v19 }
  0x59   :  { %893 = vmatpush.bf16.msra.mxu1 %v1336_v36 }
  0x5c   :  { %811 = vmatpush.bf16.msra.mxu0 %v1327_v20 }
  0x5d   :  { %894 = vmatpush.bf16.msra.mxu1 %v1335_v38 }
  0x60   :  { %812 = vmatpush.bf16.msra.mxu0 %v1326_v21 }
  0x61   :  { %895 = vmatpush.bf16.msra.mxu1 %v1334_v40 }
  0x64   :  { %813 = vmatpush.bf16.msra.mxu0 %v1325_v22 }
  0x65   :  { %896 = vmatpush.bf16.msra.mxu1 %v1333_v42 }
  0x68   :  { %814 = vmatpush.bf16.msra.mxu0 %v1324_v24 }
  0x69   :  { %897 = vmatpush.bf16.msra.mxu1 %v1332_v47 }
  0x6c   :  { %815 = vmatpush.bf16.msra.mxu0 %v1323_v26 }
  0x6d   :  { %898 = vmatpush.bf16.msra.mxu1 %v1331_v59 }
  0x70   :  { %816 = vmatpush.bf16.msra.mxu0 %v1322_v30 }
  0x71   :  { %899 = vmatpush.bf16.msra.mxu1 %v1330_v60 }
  0xb0   :  { %v644_v23 = vpop.f32.mrf.mxu0 }
  0xb1   :  { %v657_v25 = vpop.f32.mrf.mxu1  ;;  %v645_v37 = vadd.f32 %v1345_v32, %v644_v23 }
  0xb3   :  { %v658_v39 = vadd.f32 %v657_v25, %v645_v37 }
  0xb8   :  { %v670_v27 = vpop.f32.mrf.mxu2  ;;  %v646_v29 = vpop.f32.mrf.mxu0 }
  0xb9   :  { %v683_v28 = vpop.f32.mrf.mxu3  ;;  %v659_v31 = vpop.f32.mrf.mxu1  ;;  %v671_v41 = vadd.f32 %v670_v27, %v658_v39 }
  0xbb   :  { %v684_v43 = vadd.f32 %v683_v28, %v671_v41 }
  0xc0   :  { %v672_v34 = vpop.f32.mrf.mxu2 }
  0xc1   :  { %v685_v35 = vpop.f32.mrf.mxu3 }
  0xd0   :  { %v696_v44 = vpop.f32.mrf.mxu0 }
  0xd1   :  { %v709_v45 = vpop.f32.mrf.mxu1  ;;  %v697_v46 = vadd.f32 %v696_v44, %v684_v43 }
  0xd3   :  { %v710_v48 = vadd.f32 %v709_v45, %v697_v46 }
  0xd8   :  { %v722_v49 = vpop.f32.mrf.mxu2  ;;  %v698_v52 = vpop.f32.mrf.mxu0 }
  0xd9   :  { %v735_v50 = vpop.f32.mrf.mxu3  ;;  %v723_v51 = vadd.f32 %v722_v49, %v710_v48  ;;  %v711_v53 = vpop.f32.mrf.mxu1 }
  0xdb   :  { %v736_v54 = vadd.f32 %v735_v50, %v723_v51 }
  0xdd   :  { %v739_v55 = vmax.f32 %v736_v54, 0.0 }
  0xdf   :  { %v740_v56 = vpack.c.bf16 %v739_v55, %v739_v55 }
  0xe0   :  { %v724_v57 = vpop.f32.mrf.mxu2 }
  0xe1   :  { %v737_v58 = vpop.f32.mrf.mxu3  ;;  %817 = vmatmul.bf16.vlgmr.msra.gmra.mxu0 %v740_v56 }
 0x15e   :  { %v818_v62 = vpop.f32.mrf.mxu0 }
 0x15f   :  { %v819_v63 = vadd.f32 %v1346_v61, %v818_v62 }
 0x161   :  { %v822_v0 = vmax.f32 %v819_v63, 0.0 }
 0x163   :  { %v823_v1 = vpack.c.bf16 %v822_v0, %v822_v0 }
 0x165   :  { %900 = vmatmul.bf16.vlgmr.msra.gmra.mxu1 %v823_v1 }
 0x166   :  { %v820_v2 = vpop.f32.mrf.mxu0 }
 0x1e2   :  { %v901_v4 = vpop.f32.mrf.mxu1 }
 0x1e3   :  { %v902_v5 = vadd.f32 %v1347_v3, %v901_v4 }
 0x1e5   :  { %v906_v6 = vsel %vm905_vm0, %v902_v5, -inf }
 0x1e6   :  { %907 = vmax.xlane.f32.xlu0 %v906_v6 }
 0x1ea   :  { %v903_v7 = vpop.f32.mrf.mxu1 }
 0x259   :  { %v908_v8 = vpop.xlane.xlu0 %907 }
 0x25a   :  { %v909_v9 = vsub.f32 %v902_v5, %v908_v8 }
 0x25c   :  { %v910_v10 = vmul.f32 1.442695, %v909_v9 }
 0x25e   :  { %1348 = vpow2.f32 %v910_v10 }
 0x264   :  { %v1349_v11 = vpop.eup %1348 }
 0x265   :  { %v912_v12 = vsel %vm905_vm0, %v1349_v11, 0.0 }
 0x266   :  { %913 = vadd.xlane.f32.xlu0 %v912_v12 }
 0x2d9   :  { %v914_v13 = vpop.xlane.xlu0 %913 }
 0x2da   :  { %1350 = vrcp.f32 %v914_v13 }
 0x2e0   :  { %v1351_v14 = vpop.eup %1350 }
 0x2e1   :  { %v916_v15 = vmul.f32 %v1351_v14, %v1349_v11 }
 0x2e3   :  { %v917_v16 = vpack.c.bf16 %v916_v15, %v916_v15 }
 0x2e5   :  { %918 = vst [vmem:[#allocation10] sm:$0x1] %v917_v16 }
 0x2e6   :  { %929 = dma.vmem_to_hbm [thread:$0]  %s925_s24, 16, %s927_s26, [#allocation4]  }
 0x2e7   :  { %1478 = dma.done.wait [#allocation4], 16  }
 0x2e8   :  { %1479 = vsyncadd [#allocation4], 4294967280 }
 0x2e9   :  { %934 = vsyncpa [#allocation3], 1 }
 0x2ea   :  { %935 = vsyncpa [#allocation6], 1 }
 0x2eb   :  { %936 = vsyncpa [#allocation9], 1 }
 0x2ec   :  { %937 = vsyncpa [#allocation4], 1 }

</bundles_post_ra>
